<compile_context>
chip_gen: v7x
topology: tpu7x:2x2x1
jax: 0.10.0
libtpu: 0.0.40
codegen_flags: <defaults>
</compile_context>

<pallas_src>
import jax
import jax.numpy as jnp
from jax.experimental import pallas as pl
from jax.experimental.pallas import tpu as pltpu

NUM_CLASSES = 4
IN_FEATURES = 2048


def _round_up(x, m):
    return ((x + m - 1) // m) * m


def pack_params(w, b):
    """One-time parameter packing (outside the hot path).

    w: (N, K) f32 PyTorch-layout weight  -> (K, N) bf16
    b: (N,)   f32 bias                   -> (1, N) f32
    """
    w_packed = jnp.asarray(w.T, dtype=jnp.bfloat16)
    b_packed = jnp.asarray(b, dtype=jnp.float32).reshape(1, -1)
    return w_packed, b_packed


def linear_kernel(x_ref, w_ref, b_ref, o_ref):
    # x_ref: (TB, K) f32, w_ref: (K, N) bf16, b_ref: (1, N) f32, o_ref: (TB, N) f32
    # Cast to bf16 in-register (VPU) right before the MXU; accumulate in f32.
    x_bf16 = x_ref[...].astype(jnp.bfloat16)
    acc = jnp.dot(x_bf16, w_ref[...], preferred_element_type=jnp.float32)
    o_ref[...] = acc + b_ref[...]


def linear_classifier(x, w_packed, b_packed, *, max_block_b=2048):
    """x: (B, K) f32/bf16, w_packed: (K, N) bf16, b_packed: (1, N) f32 -> (B, N) f32."""
    B, K = x.shape
    Kw, N = w_packed.shape
    assert Kw == K, f"weight K ({Kw}) != x K ({K})"

    # Batch tile: multiple of 8 sublanes; aim for >= 4 grid steps when B is large
    # (so both v7x TensorCores get work and the x DMA pipeline has >1 step to
    # overlap), capped so the f32 x double-buffer stays modest (2048x2048 f32 =
    # 16 MiB / buffer).
    B8 = _round_up(max(B, 8), 8)
    TB = min(max_block_b, max(8, _round_up(pl.cdiv(B8, 4), 8)))
    grid = (pl.cdiv(B, TB),)

    # Explicit scoped-VMEM budget: double-buffered f32 x tiles dominate; output and
    # weight tiles are lane-padded to 128 internally. Floor covers small-B cases,
    # cap keeps headroom under v7x's 64 MiB physical VMEM.
    vmem_bytes = (
        2 * TB * K * x.dtype.itemsize        # x double buffer
        + 2 * TB * 128 * 4                   # out double buffer (lane-padded f32)
        + 2 * K * 128 * 2                    # weight buffers (lane-padded bf16)
        + (4 << 20)                          # bias + internal scratch headroom
    )
    vmem_limit = int(min(max(vmem_bytes, 16 << 20), 50 << 20))

    return pl.pallas_call(
        linear_kernel,
        out_shape=jax.ShapeDtypeStruct((B, N), jnp.float32),
        grid=grid,
        in_specs=[
            pl.BlockSpec((TB, K), lambda i: (i, 0)),   # batch-tiled activations (f32)
            pl.BlockSpec((K, N), lambda i: (0, 0)),    # weight resident across grid
            pl.BlockSpec((1, N), lambda i: (0, 0)),    # bias resident across grid
        ],
        out_specs=pl.BlockSpec((TB, N), lambda i: (i, 0)),  # N == full dim -> legal
        compiler_params=pltpu.CompilerParams(
            dimension_semantics=("parallel",),  # batch axis -> shard across TCs
            vmem_limit_bytes=vmem_limit,
        ),
    )(x, w_packed, b_packed)


if __name__ == "__main__":
    key = jax.random.PRNGKey(0)
    kx, kw, kb = jax.random.split(key, 3)

    batch = 8
    # Deterministic parameter init (mimicking nn.Linear uniform bound 1/sqrt(in_features))
    bound = 1.0 / (IN_FEATURES ** 0.5)
    w = jax.random.uniform(kw, (NUM_CLASSES, IN_FEATURES), jnp.float32, -bound, bound)
    b = jax.random.uniform(kb, (NUM_CLASSES,), jnp.float32, -bound, bound)
    x = jax.random.normal(kx, (batch, IN_FEATURES), jnp.float32)

    # One-time parameter packing, outside the hot call path.
    w_packed, b_packed = pack_params(w, b)

    out = linear_classifier(x, w_packed, b_packed)
    out = jax.block_until_ready(out)

    # Reference check in plain JAX (same math as PyTorch nn.Linear), f32.
    ref = x @ w.T + b
    assert out.shape == (batch, NUM_CLASSES)
    # Tolerance accounts for bf16 quantization of x/W over a K=2048 reduction.
    max_err = jnp.max(jnp.abs(out - ref))
    assert jnp.allclose(out, ref, atol=3e-2, rtol=3e-2), f"max abs err {max_err}"

    print("KERNEL_OK")
</pallas_src>

<mosaic_0001>
module attributes {stable_mosaic.version = 11 : i64} {
  func.func @linear_kernel(%arg0: i32, %arg1: memref<8x2048xf32, #tpu.memory_space<vmem>>, %arg2: memref<2048x4xbf16, #tpu.memory_space<vmem>>, %arg3: memref<1x4xf32, #tpu.memory_space<vmem>>, %arg4: memref<8x4xf32, #tpu.memory_space<vmem>>) attributes {dimension_semantics = [#tpu.dimension_semantics<parallel>], iteration_bounds = array<i64: 1>, scalar_prefetch = 0 : i64, scratch_operands = 0 : i64, tpu.core_type = #tpu.core_type<tc>, window_params = [{transform_indices = @transform_0, window_bounds = array<i64: 8, 2048>}, {pipeline_mode = #tpu.pipeline_mode<synchronous>, transform_indices = @transform_1, window_bounds = array<i64: 2048, 4>}, {pipeline_mode = #tpu.pipeline_mode<synchronous>, transform_indices = @transform_2, window_bounds = array<i64: 1, 4>}, {transform_indices = @transform_3, window_bounds = array<i64: 8, 4>}]} {
    %c0 = arith.constant 0 : index
    %c0_0 = arith.constant 0 : index
    %0 = vector.load %arg1[%c0, %c0_0] : memref<8x2048xf32, #tpu.memory_space<vmem>>, vector<8x2048xf32>
    %1 = arith.truncf %0 : vector<8x2048xf32> to vector<8x2048xbf16>
    %c0_1 = arith.constant 0 : index
    %c0_2 = arith.constant 0 : index
    %2 = vector.load %arg2[%c0_1, %c0_2] : memref<2048x4xbf16, #tpu.memory_space<vmem>>, vector<2048x4xbf16>
    %cst = arith.constant dense<0.000000e+00> : vector<8x4xf32>
    %3 = tpu.matmul %1, %2, %cst {dimension_numbers = #tpu.dot_dimension_numbers<[1], [0], [0], [1], [0, 0, 1, 1], [], []>} : vector<8x2048xbf16>, vector<2048x4xbf16>, vector<8x4xf32> -> vector<8x4xf32>
    %c0_3 = arith.constant 0 : index
    %c0_4 = arith.constant 0 : index
    %4 = vector.load %arg3[%c0_3, %c0_4] : memref<1x4xf32, #tpu.memory_space<vmem>>, vector<1x4xf32>
    %5 = vector.broadcast %4 : vector<1x4xf32> to vector<8x4xf32>
    %6 = arith.addf %3, %5 : vector<8x4xf32>
    %c0_5 = arith.constant 0 : index
    %c0_6 = arith.constant 0 : index
    %7 = vector.load %arg4[%c0_5, %c0_6] : memref<8x4xf32, #tpu.memory_space<vmem>>, vector<8x4xf32>
    tpu.vector_store %arg4[%c0_5, %c0_6], %6 {strides = array<i32>} : memref<8x4xf32, #tpu.memory_space<vmem>>, vector<8x4xf32>,
    return
  }
  func.func @transform_0(%arg0: i32) -> (i32, i32) {
    %c0_i32 = arith.constant 0 : i32
    %c0_i32_0 = arith.constant 0 : i32
    return %arg0, %c0_i32 : i32, i32
  }
  func.func @transform_1(%arg0: i32) -> (i32, i32) {
    %c0_i32 = arith.constant 0 : i32
    %c0_i32_0 = arith.constant 0 : i32
    %c0_i32_1 = arith.constant 0 : i32
    return %c0_i32, %c0_i32_0 : i32, i32
  }
  func.func @transform_2(%arg0: i32) -> (i32, i32) {
    %c0_i32 = arith.constant 0 : i32
    %c0_i32_0 = arith.constant 0 : i32
    %c0_i32_1 = arith.constant 0 : i32
    return %c0_i32, %c0_i32_0 : i32, i32
  }
  func.func @transform_3(%arg0: i32) -> (i32, i32) {
    %c0_i32 = arith.constant 0 : i32
    %c0_i32_0 = arith.constant 0 : i32
    return %arg0, %c0_i32 : i32, i32
  }
}

</mosaic_0001>

<bundles_post_ra>
// kernel: tpu_custom_call.1
= control target key start
LH: loop header
LB: loop body
LE: loop exit
PB: predicated region body
PF: predicated region fallthrough
CT: control target
= control target key end

     0   :  { %vm1398_vm0 = vcmask 31744   ;;  %s2295_s1 = inlined_call_operand.vmem [shape: bf16[2048,4], index: 1, kind: input, shape index: {}]   ;;  %s2296_s0 = inlined_call_operand.vmem [shape: f32[8,2048], index: 0, kind: input, shape index: {}]   ;;  %s2297_s2 = inlined_call_operand.vmem [shape: f32[1,4], index: 2, kind: input, shape index: {}]   ;;  %s2298_s3 = inlined_call_operand.vmem [shape: f32[8,4], index: 3, kind: output, shape index: {}]  }
   0x1   :  { %v1709_v0 = vld [vmem:[%s2295_s1 + $0x40] sm:$0xff]   ;;  %v1713_v4 = vld [vmem:[%s2295_s1 + $0x48] sm:$0xff]   ;;  %v1717_v8 = vld [vmem:[%s2295_s1 + $0x50] sm:$0xff]  }
   0x2   :  { %v1710_v1 = vld [vmem:[%s2295_s1 + $0xc0] sm:$0xff]   ;;  %1533 = vmatprep.subr.bf16.mxu0 %v1709_v0  ;;  %v1714_v5 = vld [vmem:[%s2295_s1 + $0xc8] sm:$0xff]   ;;  %v1718_v9 = vld [vmem:[%s2295_s1 + $0xd0] sm:$0xff]  }
   0x3   :  { %v1711_v2 = vld [vmem:[%s2295_s1] sm:$0xff]   ;;  %1555 = vmatprep.subr.bf16.mxu1 %v1710_v1  ;;  %v1715_v6 = vld [vmem:[%s2295_s1 + $0x8] sm:$0xff]   ;;  %v1719_v10 = vld [vmem:[%s2295_s1 + $0x10] sm:$0xff]  }
   0x4   :  { %v1712_v3 = vld [vmem:[%s2295_s1 + $0x80] sm:$0xff]   ;;  %1534 = vmatpush3.bf16.msra.mxu0 %v1711_v2  ;;  %v1716_v7 = vld [vmem:[%s2295_s1 + $0x88] sm:$0xff]   ;;  %v1720_v11 = vld [vmem:[%s2295_s1 + $0x90] sm:$0xff]  }
   0x5   :  { %1556 = vmatpush3.bf16.msra.mxu1 %v1712_v3  ;;  %1535 = vmatprep.subr.bf16.mxu0 %v1713_v4  ;;  %v1721_v12 = vld [vmem:[%s2295_s1 + $0x58] sm:$0xff]   ;;  %v1725_v16 = vld [vmem:[%s2295_s1 + $0x60] sm:$0xff]   ;;  %v1729_v20 = vld [vmem:[%s2295_s1 + $0x68] sm:$0xff]  }
   0x6   :  { %1557 = vmatprep.subr.bf16.mxu1 %v1714_v5  ;;  %v1722_v13 = vld [vmem:[%s2295_s1 + $0xd8] sm:$0xff]   ;;  %v1726_v17 = vld [vmem:[%s2295_s1 + $0xe0] sm:$0xff]   ;;  %v1730_v21 = vld [vmem:[%s2295_s1 + $0xe8] sm:$0xff]  }
   0x7   :  { %v1723_v14 = vld [vmem:[%s2295_s1 + $0x18] sm:$0xff]   ;;  %v1727_v18 = vld [vmem:[%s2295_s1 + $0x20] sm:$0xff]   ;;  %v1731_v22 = vld [vmem:[%s2295_s1 + $0x28] sm:$0xff]  }
   0x8   :  { %1536 = vmatpush3.bf16.msra.mxu0 %v1715_v6  ;;  %v1724_v15 = vld [vmem:[%s2295_s1 + $0x98] sm:$0xff]   ;;  %v1728_v19 = vld [vmem:[%s2295_s1 + $0xa0] sm:$0xff]   ;;  %v1732_v23 = vld [vmem:[%s2295_s1 + $0xa8] sm:$0xff]  }
   0x9   :  { %1558 = vmatpush3.bf16.msra.mxu1 %v1716_v7  ;;  %1537 = vmatprep.subr.bf16.mxu0 %v1717_v8  ;;  %v1733_v24 = vld [vmem:[%s2295_s1 + $0x70] sm:$0xff]   ;;  %v1737_v28 = vld [vmem:[%s2295_s1 + $0x78] sm:$0xff]   ;;  %v16_v32 = vld [vmem:[%s2296_s0 + $0x8] sm:$0xff] }
   0xa   :  { %1559 = vmatprep.subr.bf16.mxu1 %v1718_v9  ;;  %v1734_v25 = vld [vmem:[%s2295_s1 + $0xf0] sm:$0xff]   ;;  %v1738_v29 = vld [vmem:[%s2295_s1 + $0xf8] sm:$0xff]   ;;  %v15_v34 = vld [vmem:[%s2296_s0] sm:$0xff]  ;;  %v32_v35 = vpack.c.bf16 %v16_v32, %v16_v32 }
   0xb   :  { %v1735_v26 = vld [vmem:[%s2295_s1 + $0x30] sm:$0xff]   ;;  %v1739_v30 = vld [vmem:[%s2295_s1 + $0x38] sm:$0xff]   ;;  %v31_v37 = vpack.c.bf16 %v15_v34, %v15_v34  ;;  %v1741_v40 = vld [vmem:[%s2295_s1 + $0x140] sm:$0xff]  }
   0xc   :  { %1538 = vmatpush3.bf16.msra.mxu0 %v1719_v10  ;;  %v1736_v27 = vld [vmem:[%s2295_s1 + $0xb0] sm:$0xff]   ;;  %v1740_v31 = vld [vmem:[%s2295_s1 + $0xb8] sm:$0xff]   ;;  %1110 = vmatprep.mubr.bf16.mxu0 %v32_v35  ;;  %v1742_v41 = vld [vmem:[%s2295_s1 + $0x1c0] sm:$0xff]  }
   0xd   :  { %1560 = vmatpush3.bf16.msra.mxu1 %v1720_v11  ;;  %1539 = vmatprep.subr.bf16.mxu0 %v1721_v12  ;;  %v18_v33 = vld [vmem:[%s2296_s0 + $0x18] sm:$0xff]  ;;  %v17_v38 = vld [vmem:[%s2296_s0 + $0x10] sm:$0xff]  ;;  %v1743_v42 = vld [vmem:[%s2295_s1 + $0x100] sm:$0xff]  }
   0xe   :  { %1561 = vmatprep.subr.bf16.mxu1 %v1722_v13  ;;  %v34_v36 = vpack.c.bf16 %v18_v33, %v18_v33  ;;  %v33_v39 = vpack.c.bf16 %v17_v38, %v17_v38  ;;  %v1744_v43 = vld [vmem:[%s2295_s1 + $0x180] sm:$0xff]   ;;  %v1745_v44 = vld [vmem:[%s2295_s1 + $0x148] sm:$0xff]   ;;  %v1749_v48 = vld [vmem:[%s2295_s1 + $0x150] sm:$0xff]  }
   0xf   :  { %v1746_v45 = vld [vmem:[%s2295_s1 + $0x1c8] sm:$0xff]   ;;  %v1750_v49 = vld [vmem:[%s2295_s1 + $0x1d0] sm:$0xff]   ;;  %v1753_v52 = vld [vmem:[%s2295_s1 + $0x158] sm:$0xff]  }
  0x10   :  { %1540 = vmatpush3.bf16.msra.mxu0 %v1723_v14  ;;  %1150 = vmatprep.mubr.bf16.mxu1 %v34_v36  ;;  %v1747_v46 = vld [vmem:[%s2295_s1 + $0x108] sm:$0xff]   ;;  %v1751_v50 = vld [vmem:[%s2295_s1 + $0x110] sm:$0xff]   ;;  %v1754_v53 = vld [vmem:[%s2295_s1 + $0x1d8] sm:$0xff]  }
  0x11   :  { %1562 = vmatpush3.bf16.msra.mxu1 %v1724_v15  ;;  %1541 = vmatprep.subr.bf16.mxu0 %v1725_v16  ;;  %v1748_v47 = vld [vmem:[%s2295_s1 + $0x188] sm:$0xff]   ;;  %v1752_v51 = vld [vmem:[%s2295_s1 + $0x190] sm:$0xff]   ;;  %v1755_v54 = vld [vmem:[%s2295_s1 + $0x118] sm:$0xff]  }
  0x12   :  { %1563 = vmatprep.subr.bf16.mxu1 %v1726_v17  ;;  %v1756_v55 = vld [vmem:[%s2295_s1 + $0x198] sm:$0xff]   ;;  %v1757_v56 = vld [vmem:[%s2295_s1 + $0x160] sm:$0xff]   ;;  %v1761_v60 = vld [vmem:[%s2295_s1 + $0x168] sm:$0xff]  }
  0x13   :  { %v1758_v57 = vld [vmem:[%s2295_s1 + $0x1e0] sm:$0xff]   ;;  %v1762_v61 = vld [vmem:[%s2295_s1 + $0x1e8] sm:$0xff]   ;;  %v1765_v0 = vld [vmem:[%s2295_s1 + $0x170] sm:$0xff]  }
  0x14   :  { %1542 = vmatpush3.bf16.msra.mxu0 %v1727_v18  ;;  %v1759_v58 = vld [vmem:[%s2295_s1 + $0x120] sm:$0xff]   ;;  %v1763_v62 = vld [vmem:[%s2295_s1 + $0x128] sm:$0xff]   ;;  %v1766_v1 = vld [vmem:[%s2295_s1 + $0x1f0] sm:$0xff]  }
  0x15   :  { %1564 = vmatpush3.bf16.msra.mxu1 %v1728_v19  ;;  %1543 = vmatprep.subr.bf16.mxu0 %v1729_v20  ;;  %v1760_v59 = vld [vmem:[%s2295_s1 + $0x1a0] sm:$0xff]   ;;  %v1764_v63 = vld [vmem:[%s2295_s1 + $0x1a8] sm:$0xff]   ;;  %v1767_v2 = vld [vmem:[%s2295_s1 + $0x130] sm:$0xff]  }
  0x16   :  { %1565 = vmatprep.subr.bf16.mxu1 %v1730_v21  ;;  %v1768_v3 = vld [vmem:[%s2295_s1 + $0x1b0] sm:$0xff]   ;;  %v1769_v4 = vld [vmem:[%s2295_s1 + $0x178] sm:$0xff]   ;;  %v20_v8 = vld [vmem:[%s2296_s0 + $0x28] sm:$0xff] }
  0x17   :  { %v1770_v5 = vld [vmem:[%s2295_s1 + $0x1f8] sm:$0xff]   ;;  %v36_v10 = vpack.c.bf16 %v20_v8, %v20_v8  ;;  %v19_v12 = vld [vmem:[%s2296_s0 + $0x20] sm:$0xff]  ;;  %v21_v13 = vld [vmem:[%s2296_s0 + $0x30] sm:$0xff] }
  0x18   :  { %1544 = vmatpush3.bf16.msra.mxu0 %v1731_v22  ;;  %v1771_v6 = vld [vmem:[%s2295_s1 + $0x138] sm:$0xff]   ;;  %v35_v14 = vpack.c.bf16 %v19_v12, %v19_v12  ;;  %v37_v15 = vpack.c.bf16 %v21_v13, %v21_v13  ;;  %v1773_v16 = vld [vmem:[%s2295_s1 + $0x240] sm:$0xff]   ;;  %v1777_v20 = vld [vmem:[%s2295_s1 + $0x248] sm:$0xff]  }
  0x19   :  { %1566 = vmatpush3.bf16.msra.mxu1 %v1732_v23  ;;  %1545 = vmatprep.subr.bf16.mxu0 %v1733_v24  ;;  %v1772_v7 = vld [vmem:[%s2295_s1 + $0x1b8] sm:$0xff]   ;;  %v1774_v17 = vld [vmem:[%s2295_s1 + $0x2c0] sm:$0xff]   ;;  %v1778_v21 = vld [vmem:[%s2295_s1 + $0x2c8] sm:$0xff]  }
  0x1a   :  { %1567 = vmatprep.subr.bf16.mxu1 %v1734_v25  ;;  %v22_v9 = vld [vmem:[%s2296_s0 + $0x38] sm:$0xff]  ;;  %v1775_v18 = vld [vmem:[%s2295_s1 + $0x200] sm:$0xff]   ;;  %v1779_v22 = vld [vmem:[%s2295_s1 + $0x208] sm:$0xff]  }
  0x1b   :  { %v38_v11 = vpack.c.bf16 %v22_v9, %v22_v9  ;;  %v1776_v19 = vld [vmem:[%s2295_s1 + $0x280] sm:$0xff]   ;;  %v1780_v23 = vld [vmem:[%s2295_s1 + $0x288] sm:$0xff]   ;;  %v1781_v24 = vld [vmem:[%s2295_s1 + $0x250] sm:$0xff]  }
  0x1c   :  { %1546 = vmatpush3.bf16.msra.mxu0 %v1735_v26  ;;  %v1782_v25 = vld [vmem:[%s2295_s1 + $0x2d0] sm:$0xff]   ;;  %v1789_v32 = vld [vmem:[%s2295_s1 + $0x260] sm:$0xff]   ;;  %v1793_v36 = vld [vmem:[%s2295_s1 + $0x268] sm:$0xff]  }
  0x1d   :  { %1568 = vmatpush3.bf16.msra.mxu1 %v1736_v27  ;;  %1547 = vmatprep.subr.bf16.mxu0 %v1737_v28  ;;  %v1783_v26 = vld [vmem:[%s2295_s1 + $0x210] sm:$0xff]   ;;  %v1785_v28 = vld [vmem:[%s2295_s1 + $0x258] sm:$0xff]   ;;  %v1790_v33 = vld [vmem:[%s2295_s1 + $0x2e0] sm:$0xff]  }
  0x1e   :  { %1569 = vmatprep.subr.bf16.mxu1 %v1738_v29  ;;  %v1784_v27 = vld [vmem:[%s2295_s1 + $0x290] sm:$0xff]   ;;  %v1786_v29 = vld [vmem:[%s2295_s1 + $0x2d8] sm:$0xff]   ;;  %v1791_v34 = vld [vmem:[%s2295_s1 + $0x220] sm:$0xff]  }
  0x1f   :  { %v1792_v35 = vld [vmem:[%s2295_s1 + $0x2a0] sm:$0xff]   ;;  %v1795_v38 = vld [vmem:[%s2295_s1 + $0x228] sm:$0xff]  }
  0x20   :  { %1548 = vmatpush3.bf16.msra.mxu0 %v1739_v30  ;;  %v1787_v30 = vld [vmem:[%s2295_s1 + $0x218] sm:$0xff]   ;;  %v1821_v8 = vld [vmem:[%s2295_s1 + $0x360] sm:$0xff]   ;;  %v1825_v12 = vld [vmem:[%s2295_s1 + $0x368] sm:$0xff]  }
  0x21   :  { %1570 = vmatpush3.bf16.msra.mxu1 %v1740_v31  ;;  %1577 = vmatprep.subr.bf16.mxu0 %v1741_v40  ;;  %v1788_v31 = vld [vmem:[%s2295_s1 + $0x298] sm:$0xff]   ;;  %v1797_v40 = vld [vmem:[%s2295_s1 + $0x270] sm:$0xff]   ;;  %v1822_v9 = vld [vmem:[%s2295_s1 + $0x3e0] sm:$0xff]  }
  0x22   :  { %1599 = vmatprep.subr.bf16.mxu1 %v1742_v41  ;;  %v1798_v41 = vld [vmem:[%s2295_s1 + $0x2f0] sm:$0xff]   ;;  %v1826_v13 = vld [vmem:[%s2295_s1 + $0x3e8] sm:$0xff]  }
  0x23   :  { %1111 = vmatmul.mubr.bf16.vlgmr.msra.gmra.mrb[0].mxu0 %v31_v37  ;;  %v1794_v37 = vld [vmem:[%s2295_s1 + $0x2e8] sm:$0xff]  }
  0x24   :  { %1151 = vmatmul.mubr.bf16.vlgmr.msra.gmra.mrb[0].mxu1 %v33_v39  ;;  %1578 = vmatpush3.bf16.msra.mxu0 %v1743_v42  ;;  %v1796_v39 = vld [vmem:[%s2295_s1 + $0x2a8] sm:$0xff]   ;;  %v1799_v42 = vld [vmem:[%s2295_s1 + $0x230] sm:$0xff]  }
  0x25   :  { %1600 = vmatpush3.bf16.msra.mxu1 %v1744_v43  ;;  %1579 = vmatprep.subr.bf16.mxu0 %v1745_v44  ;;  %v1800_v43 = vld [vmem:[%s2295_s1 + $0x2b0] sm:$0xff]   ;;  %v1801_v44 = vld [vmem:[%s2295_s1 + $0x278] sm:$0xff]  }
  0x26   :  { %1601 = vmatprep.subr.bf16.mxu1 %v1746_v45  ;;  %1190 = vmatprep.mubr.bf16.mxu0 %v36_v10  ;;  %v1802_v45 = vld [vmem:[%s2295_s1 + $0x2f8] sm:$0xff]   ;;  %v1823_v10 = vld [vmem:[%s2295_s1 + $0x320] sm:$0xff]  }
  0x27   :  { %1230 = vmatprep.mubr.bf16.mxu1 %v38_v11  ;;  %v1824_v11 = vld [vmem:[%s2295_s1 + $0x3a0] sm:$0xff]  }
  0x28   :  { %1580 = vmatpush3.bf16.msra.mxu0 %v1747_v46  ;;  %v1803_v46 = vld [vmem:[%s2295_s1 + $0x238] sm:$0xff]  }
  0x29   :  { %1602 = vmatpush3.bf16.msra.mxu1 %v1748_v47  ;;  %1581 = vmatprep.subr.bf16.mxu0 %v1749_v48  ;;  %v1804_v47 = vld [vmem:[%s2295_s1 + $0x2b8] sm:$0xff]   ;;  %v24_v48 = vld [vmem:[%s2296_s0 + $0x48] sm:$0xff] }
  0x2a   :  { %1603 = vmatprep.subr.bf16.mxu1 %v1750_v49  ;;  %v40_v49 = vpack.c.bf16 %v24_v48, %v24_v48 }
  0x2c   :  { %1582 = vmatpush3.bf16.msra.mxu0 %v1751_v50  ;;  %v26_v50 = vld [vmem:[%s2296_s0 + $0x58] sm:$0xff] }
  0x2d   :  { %1604 = vmatpush3.bf16.msra.mxu1 %v1752_v51  ;;  %1583 = vmatprep.subr.bf16.mxu0 %v1753_v52  ;;  %v23_v51 = vld [vmem:[%s2296_s0 + $0x40] sm:$0xff]  ;;  %v25_v52 = vld [vmem:[%s2296_s0 + $0x50] sm:$0xff] }
  0x2e   :  { %1605 = vmatprep.subr.bf16.mxu1 %v1754_v53  ;;  %v42_v53 = vpack.c.bf16 %v26_v50, %v26_v50 }
  0x30   :  { %1584 = vmatpush3.bf16.msra.mxu0 %v1755_v54  ;;  %v39_v54 = vpack.c.bf16 %v23_v51, %v23_v51 }
  0x31   :  { %1606 = vmatpush3.bf16.msra.mxu1 %v1756_v55  ;;  %1585 = vmatprep.subr.bf16.mxu0 %v1757_v56  ;;  %v41_v55 = vpack.c.bf16 %v25_v52, %v25_v52  ;;  %v1805_v56 = vld [vmem:[%s2295_s1 + $0x340] sm:$0xff]  }
  0x32   :  { %1607 = vmatprep.subr.bf16.mxu1 %v1758_v57  ;;  %v1806_v57 = vld [vmem:[%s2295_s1 + $0x3c0] sm:$0xff]  }
  0x34   :  { %1586 = vmatpush3.bf16.msra.mxu0 %v1759_v58  ;;  %v1807_v58 = vld [vmem:[%s2295_s1 + $0x300] sm:$0xff]  }
  0x35   :  { %1608 = vmatpush3.bf16.msra.mxu1 %v1760_v59  ;;  %1587 = vmatprep.subr.bf16.mxu0 %v1761_v60  ;;  %v1808_v59 = vld [vmem:[%s2295_s1 + $0x380] sm:$0xff]   ;;  %v1809_v60 = vld [vmem:[%s2295_s1 + $0x348] sm:$0xff]  }
  0x36   :  { %1609 = vmatprep.subr.bf16.mxu1 %v1762_v61  ;;  %v1810_v61 = vld [vmem:[%s2295_s1 + $0x3c8] sm:$0xff]  }
  0x38   :  { %1588 = vmatpush3.bf16.msra.mxu0 %v1763_v62  ;;  %v1811_v62 = vld [vmem:[%s2295_s1 + $0x308] sm:$0xff]  }
  0x39   :  { %1610 = vmatpush3.bf16.msra.mxu1 %v1764_v63  ;;  %1589 = vmatprep.subr.bf16.mxu0 %v1765_v0  ;;  %v1812_v63 = vld [vmem:[%s2295_s1 + $0x388] sm:$0xff]   ;;  %v1813_v0 = vld [vmem:[%s2295_s1 + $0x350] sm:$0xff]  }
  0x3a   :  { %1611 = vmatprep.subr.bf16.mxu1 %v1766_v1  ;;  %v1814_v1 = vld [vmem:[%s2295_s1 + $0x3d0] sm:$0xff]  }
  0x3c   :  { %1590 = vmatpush3.bf16.msra.mxu0 %v1767_v2  ;;  %v1815_v2 = vld [vmem:[%s2295_s1 + $0x310] sm:$0xff]  }
  0x3d   :  { %1612 = vmatpush3.bf16.msra.mxu1 %v1768_v3  ;;  %1591 = vmatprep.subr.bf16.mxu0 %v1769_v4  ;;  %v1816_v3 = vld [vmem:[%s2295_s1 + $0x390] sm:$0xff]   ;;  %v1817_v4 = vld [vmem:[%s2295_s1 + $0x358] sm:$0xff]  }
  0x3e   :  { %1613 = vmatprep.subr.bf16.mxu1 %v1770_v5  ;;  %v1818_v5 = vld [vmem:[%s2295_s1 + $0x3d8] sm:$0xff]  }
  0x40   :  { %1592 = vmatpush3.bf16.msra.mxu0 %v1771_v6  ;;  %v1819_v6 = vld [vmem:[%s2295_s1 + $0x318] sm:$0xff]  }
  0x41   :  { %1614 = vmatpush3.bf16.msra.mxu1 %v1772_v7  ;;  %1621 = vmatprep.subr.bf16.mxu0 %v1773_v16  ;;  %v1820_v7 = vld [vmem:[%s2295_s1 + $0x398] sm:$0xff]   ;;  %v1829_v16 = vld [vmem:[%s2295_s1 + $0x370] sm:$0xff]  }
  0x42   :  { %1643 = vmatprep.subr.bf16.mxu1 %v1774_v17  ;;  %v1830_v17 = vld [vmem:[%s2295_s1 + $0x3f0] sm:$0xff]  }
  0x43   :  { %1191 = vmatmul.mubr.bf16.vlgmr.msra.gmra.mrb[4].mxu0 %v35_v14  ;;  %v1827_v14 = vld [vmem:[%s2295_s1 + $0x328] sm:$0xff]  }
  0x44   :  { %1231 = vmatmul.mubr.bf16.vlgmr.msra.gmra.mrb[4].mxu1 %v37_v15  ;;  %1622 = vmatpush3.bf16.msra.mxu0 %v1775_v18  ;;  %v1828_v15 = vld [vmem:[%s2295_s1 + $0x3a8] sm:$0xff]   ;;  %v1831_v18 = vld [vmem:[%s2295_s1 + $0x330] sm:$0xff]  }
  0x45   :  { %1644 = vmatpush3.bf16.msra.mxu1 %v1776_v19  ;;  %1623 = vmatprep.subr.bf16.mxu0 %v1777_v20  ;;  %v1832_v19 = vld [vmem:[%s2295_s1 + $0x3b0] sm:$0xff]   ;;  %v1833_v20 = vld [vmem:[%s2295_s1 + $0x378] sm:$0xff]  }
  0x46   :  { %1645 = vmatprep.subr.bf16.mxu1 %v1778_v21  ;;  %1270 = vmatprep.mubr.bf16.mxu0 %v40_v49  ;;  %v1834_v21 = vld [vmem:[%s2295_s1 + $0x3f8] sm:$0xff]  }
  0x47   :  { %1310 = vmatprep.mubr.bf16.mxu1 %v42_v53 }
  0x48   :  { %1624 = vmatpush3.bf16.msra.mxu0 %v1779_v22  ;;  %v1835_v22 = vld [vmem:[%s2295_s1 + $0x338] sm:$0xff]  }
  0x49   :  { %1646 = vmatpush3.bf16.msra.mxu1 %v1780_v23  ;;  %1625 = vmatprep.subr.bf16.mxu0 %v1781_v24  ;;  %v1836_v23 = vld [vmem:[%s2295_s1 + $0x3b8] sm:$0xff]   ;;  %v28_v24 = vld [vmem:[%s2296_s0 + $0x68] sm:$0xff] }
  0x4a   :  { %1647 = vmatprep.subr.bf16.mxu1 %v1782_v25  ;;  %v30_v25 = vld [vmem:[%s2296_s0 + $0x78] sm:$0xff] }
  0x4c   :  { %1626 = vmatpush3.bf16.msra.mxu0 %v1783_v26  ;;  %v27_v26 = vld [vmem:[%s2296_s0 + $0x60] sm:$0xff] }
  0x4d   :  { %1648 = vmatpush3.bf16.msra.mxu1 %v1784_v27  ;;  %1627 = vmatprep.subr.bf16.mxu0 %v1785_v28  ;;  %v44_v27 = vpack.c.bf16 %v28_v24, %v28_v24  ;;  %v46_v28 = vpack.c.bf16 %v30_v25, %v30_v25 }
  0x4e   :  { %1649 = vmatprep.subr.bf16.mxu1 %v1786_v29  ;;  %v43_v29 = vpack.c.bf16 %v27_v26, %v27_v26 }
  0x50   :  { %1628 = vmatpush3.bf16.msra.mxu0 %v1787_v30  ;;  %v29_v30 = vld [vmem:[%s2296_s0 + $0x70] sm:$0xff] }
  0x51   :  { %1650 = vmatpush3.bf16.msra.mxu1 %v1788_v31  ;;  %1629 = vmatprep.subr.bf16.mxu0 %v1789_v32  ;;  %v45_v31 = vpack.c.bf16 %v29_v30, %v29_v30 }
  0x52   :  { %1651 = vmatprep.subr.bf16.mxu1 %v1790_v33 }
  0x54   :  { %1630 = vmatpush3.bf16.msra.mxu0 %v1791_v34  ;;  %v1404_v34 = vld [vmem:[%s2297_s2] ss:$0 sm:$0xff] }
  0x55   :  { %1652 = vmatpush3.bf16.msra.mxu1 %v1792_v35  ;;  %1631 = vmatprep.subr.bf16.mxu0 %v1793_v36 }
  0x56   :  { %1653 = vmatprep.subr.bf16.mxu1 %v1794_v37 }
  0x58   :  { %1632 = vmatpush3.bf16.msra.mxu0 %v1795_v38 }
  0x59   :  { %1654 = vmatpush3.bf16.msra.mxu1 %v1796_v39  ;;  %1633 = vmatprep.subr.bf16.mxu0 %v1797_v40 }
  0x5a   :  { %1655 = vmatprep.subr.bf16.mxu1 %v1798_v41 }
  0x5c   :  { %1634 = vmatpush3.bf16.msra.mxu0 %v1799_v42 }
  0x5d   :  { %1656 = vmatpush3.bf16.msra.mxu1 %v1800_v43  ;;  %1635 = vmatprep.subr.bf16.mxu0 %v1801_v44 }
  0x5e   :  { %1657 = vmatprep.subr.bf16.mxu1 %v1802_v45 }
  0x60   :  { %1636 = vmatpush3.bf16.msra.mxu0 %v1803_v46 }
  0x61   :  { %1658 = vmatpush3.bf16.msra.mxu1 %v1804_v47  ;;  %1665 = vmatprep.subr.bf16.mxu0 %v1805_v56 }
  0x62   :  { %1687 = vmatprep.subr.bf16.mxu1 %v1806_v57 }
  0x63   :  { %1271 = vmatmul.mubr.bf16.vlgmr.msra.gmra.mrb[8].mxu0 %v39_v54 }
  0x64   :  { %1311 = vmatmul.mubr.bf16.vlgmr.msra.gmra.mrb[8].mxu1 %v41_v55  ;;  %1666 = vmatpush3.bf16.msra.mxu0 %v1807_v58 }
  0x65   :  { %1688 = vmatpush3.bf16.msra.mxu1 %v1808_v59  ;;  %1667 = vmatprep.subr.bf16.mxu0 %v1809_v60 }
  0x66   :  { %1689 = vmatprep.subr.bf16.mxu1 %v1810_v61  ;;  %1350 = vmatprep.mubr.bf16.mxu0 %v44_v27 }
  0x67   :  { %1390 = vmatprep.mubr.bf16.mxu1 %v46_v28 }
  0x68   :  { %1668 = vmatpush3.bf16.msra.mxu0 %v1811_v62 }
  0x69   :  { %1690 = vmatpush3.bf16.msra.mxu1 %v1812_v63  ;;  %1669 = vmatprep.subr.bf16.mxu0 %v1813_v0 }
  0x6a   :  { %1691 = vmatprep.subr.bf16.mxu1 %v1814_v1 }
  0x6c   :  { %1670 = vmatpush3.bf16.msra.mxu0 %v1815_v2 }
  0x6d   :  { %1692 = vmatpush3.bf16.msra.mxu1 %v1816_v3  ;;  %1671 = vmatprep.subr.bf16.mxu0 %v1817_v4 }
  0x6e   :  { %1693 = vmatprep.subr.bf16.mxu1 %v1818_v5 }
  0x70   :  { %1672 = vmatpush3.bf16.msra.mxu0 %v1819_v6 }
  0x71   :  { %1694 = vmatpush3.bf16.msra.mxu1 %v1820_v7  ;;  %1673 = vmatprep.subr.bf16.mxu0 %v1821_v8 }
  0x72   :  { %1695 = vmatprep.subr.bf16.mxu1 %v1822_v9 }
  0x74   :  { %1674 = vmatpush3.bf16.msra.mxu0 %v1823_v10 }
  0x75   :  { %1696 = vmatpush3.bf16.msra.mxu1 %v1824_v11  ;;  %1675 = vmatprep.subr.bf16.mxu0 %v1825_v12 }
  0x76   :  { %1697 = vmatprep.subr.bf16.mxu1 %v1826_v13 }
  0x78   :  { %1676 = vmatpush3.bf16.msra.mxu0 %v1827_v14 }
  0x79   :  { %1698 = vmatpush3.bf16.msra.mxu1 %v1828_v15  ;;  %1677 = vmatprep.subr.bf16.mxu0 %v1829_v16 }
  0x7a   :  { %1699 = vmatprep.subr.bf16.mxu1 %v1830_v17 }
  0x7c   :  { %1678 = vmatpush3.bf16.msra.mxu0 %v1831_v18 }
  0x7d   :  { %1700 = vmatpush3.bf16.msra.mxu1 %v1832_v19  ;;  %1679 = vmatprep.subr.bf16.mxu0 %v1833_v20 }
  0x7e   :  { %1701 = vmatprep.subr.bf16.mxu1 %v1834_v21 }
  0x80   :  { %1680 = vmatpush3.bf16.msra.mxu0 %v1835_v22 }
  0x81   :  { %1702 = vmatpush3.bf16.msra.mxu1 %v1836_v23 }
  0x83   :  { %1351 = vmatmul.mubr.bf16.vlgmr.msra.gmra.mrb[12].mxu0 %v43_v29 }
  0x84   :  { %1391 = vmatmul.mubr.bf16.vlgmr.msra.gmra.mrb[12].mxu1 %v45_v31 }
  0xf6   :  { %v1549_v32 = vpop.f32.mrb[0].mxu0 }
  0xf7   :  { %v1571_v33 = vpop.f32.mrb[0].mxu1  ;;  %v1550_v35 = vpop.f32.mrb[1].mxu0 }
  0xf8   :  { %v1572_v36 = vpop.f32.mrb[1].mxu1  ;;  %v1551_v37 = vadd.f32 %v1550_v35, %v1549_v32  ;;  %v1552_v39 = vpop.f32.mrb[2].mxu0 }
  0xf9   :  { %v1573_v38 = vadd.f32 %v1572_v36, %v1571_v33  ;;  %v1574_v40 = vpop.f32.mrb[2].mxu1  ;;  %v1553_v41 = vpop.f32.mrb[3].mxu0 }
  0xfa   :  { %v1575_v42 = vpop.f32.mrb[3].mxu1  ;;  %v1113_v43 = vadd.f32 %v1551_v37, %v1404_v34 }
  0xfc   :  { %v1153_v44 = vadd.f32 %v1573_v38, %v1113_v43 }
 0x116   :  { %v1593_v45 = vpop.f32.mrb[4].mxu0 }
 0x117   :  { %v1615_v46 = vpop.f32.mrb[4].mxu1  ;;  %v1594_v47 = vpop.f32.mrb[5].mxu0 }
 0x118   :  { %v1595_v48 = vadd.f32 %v1594_v47, %v1593_v45  ;;  %v1616_v49 = vpop.f32.mrb[5].mxu1  ;;  %v1596_v50 = vpop.f32.mrb[6].mxu0 }
 0x119   :  { %v1617_v51 = vadd.f32 %v1616_v49, %v1615_v46  ;;  %v1618_v52 = vpop.f32.mrb[6].mxu1  ;;  %v1597_v53 = vpop.f32.mrb[7].mxu0 }
 0x11a   :  { %v1193_v54 = vadd.f32 %v1595_v48, %v1153_v44  ;;  %v1619_v55 = vpop.f32.mrb[7].mxu1 }
 0x11c   :  { %v1233_v56 = vadd.f32 %v1617_v51, %v1193_v54 }
 0x136   :  { %v1637_v57 = vpop.f32.mrb[8].mxu0 }
 0x137   :  { %v1659_v58 = vpop.f32.mrb[8].mxu1  ;;  %v1638_v59 = vpop.f32.mrb[9].mxu0 }
 0x138   :  { %v1639_v60 = vadd.f32 %v1638_v59, %v1637_v57  ;;  %v1660_v61 = vpop.f32.mrb[9].mxu1  ;;  %v1640_v62 = vpop.f32.mrb[10].mxu0 }
 0x139   :  { %v1661_v63 = vadd.f32 %v1660_v61, %v1659_v58  ;;  %v1662_v0 = vpop.f32.mrb[10].mxu1  ;;  %v1641_v1 = vpop.f32.mrb[11].mxu0 }
 0x13a   :  { %v1273_v2 = vadd.f32 %v1639_v60, %v1233_v56  ;;  %v1663_v3 = vpop.f32.mrb[11].mxu1 }
 0x13c   :  { %v1313_v4 = vadd.f32 %v1661_v63, %v1273_v2 }
 0x156   :  { %v1681_v5 = vpop.f32.mrb[12].mxu0 }
 0x157   :  { %v1703_v6 = vpop.f32.mrb[12].mxu1  ;;  %v1682_v7 = vpop.f32.mrb[13].mxu0 }
 0x158   :  { %v1704_v8 = vpop.f32.mrb[13].mxu1  ;;  %v1683_v9 = vadd.f32 %v1682_v7, %v1681_v5  ;;  %v1684_v11 = vpop.f32.mrb[14].mxu0 }
 0x159   :  { %v1705_v10 = vadd.f32 %v1704_v8, %v1703_v6  ;;  %v1706_v12 = vpop.f32.mrb[14].mxu1  ;;  %v1685_v13 = vpop.f32.mrb[15].mxu0 }
 0x15a   :  { %v1707_v14 = vpop.f32.mrb[15].mxu1  ;;  %v1353_v15 = vadd.f32 %v1683_v9, %v1313_v4 }
 0x15c   :  { %v1393_v16 = vadd.f32 %v1705_v10, %v1353_v15 }
 0x15e   :  { %1399 = vst.msk [vmem:[%s2298_s3] sm:$0xff] %vm1398_vm0, %v1393_v16 }

</bundles_post_ra>
